<compile_context>
chip_gen: v7x
topology: tpu7x:2x2x1
jax: 0.10.0
libtpu: 0.0.40
codegen_flags: <defaults>
</compile_context>

<pallas_src>
import functools
import math

import jax
import jax.numpy as jnp
from jax import lax
from jax.experimental import pallas as pl
from jax.experimental.pallas import tpu as pltpu


def _transformer_layer_kernel(
    x_ref,                      # (L, C)   full sequence of one batch element (activation dtype)
    wq_ref, wk_ref, wv_ref,     # (C, C)   fused q/k/v projections (pre-transposed, q pre-scaled)
    b_in_ref,                   # (3,1,C)  f32 in-proj biases [q*scale, k, v]
    wo_ref,                     # (C, C)   MHA out-projection (pre-transposed)
    bo_ref,                     # (1, C)   f32 out-projection bias
    wffn_ref,                   # (C, C)   fused fc2(fc1(.)) weight (pre-transposed)
    o_ref,                      # (TQ, C)  output tile
    *, num_heads, q_tile,
):
    f32 = jnp.float32
    cdt = x_ref.dtype                         # MXU operand dtype (bf16 stays bf16, f32 stays f32)
    L, C = x_ref.shape
    TQ = q_tile
    D = C // num_heads

    qt = pl.program_id(1)
    q_start = pl.multiple_of(qt * TQ, TQ)

    x_all = x_ref[...]                        # (L, C)  source for K / V
    x_q = x_ref[pl.ds(q_start, TQ), :]        # (TQ, C) query rows of this tile

    def mm(a, w_ref):
        return jnp.dot(a.astype(cdt), w_ref[...], preferred_element_type=f32)

    # Fused projections (single x @ W_eff each); biases added in f32.
    q = mm(x_q, wq_ref) + b_in_ref[0]         # (TQ, C) f32 (scale already folded in)
    k = mm(x_all, wk_ref) + b_in_ref[1]       # (L,  C) f32
    v = mm(x_all, wv_ref) + b_in_ref[2]       # (L,  C) f32

    # Accumulate the out-projection per head into one lane-dense (TQ, C) slab,
    # seeded with the out-proj bias and the first residual (no concat of D-wide slices).
    x1 = x_q.astype(f32) + bo_ref[...]        # (TQ, C) f32
    # TODO(synk): for num_heads >= 8 switch to lax.fori_loop carrying `x1` to bound vreg
    # live ranges; the static loop is fine at small head counts.
    for h in range(num_heads):
        sl = slice(h * D, (h + 1) * D)
        qh = q[:, sl].astype(cdt)                                             # (TQ, D)
        kh = k[:, sl].astype(cdt)                                             # (L,  D)
        vh = v[:, sl].astype(cdt)                                             # (L,  D)
        s = lax.dot_general(qh, kh, (((1,), (1,)), ((), ())),
                            preferred_element_type=f32)                       # (TQ, L)
        m = jnp.max(s, axis=-1, keepdims=True)
        e = jnp.exp(s - m)                                                    # unnormalized probs
        r = pl.reciprocal(jnp.sum(e, axis=-1, keepdims=True))                 # (TQ, 1)
        oh = jnp.dot(e.astype(cdt), vh, preferred_element_type=f32) * r       # (TQ, D)
        # head-slice (rows h*D:(h+1)*D) of the transposed out-projection weight
        x1 = x1 + jnp.dot(oh.astype(cdt), wo_ref[sl, :],
                          preferred_element_type=f32)                         # (TQ, C)

    # Fused feed-forward fc2(fc1(.)) (no bias) + second residual.
    y = mm(x1, wffn_ref) + x1
    o_ref[...] = y.astype(o_ref.dtype)


def _pick_q_tile(L, max_tile):
    """Largest multiple-of-8 divisor of L not exceeding max_tile (or L itself)."""
    if L <= max_tile:
        return L
    start = max_tile - (max_tile % 8)
    for t in range(start, 7, -8):
        if L % t == 0:
            return t
    return L  # TODO(synk): ragged last-tile support; falls back to a single full-L tile.


def transformer_layer_batch_major(x_nlc, params, num_heads, *, max_q_tile=256):
    """Fused TransformerLayer forward on batch-major input x_nlc: (N, L, C)."""
    N, L, C = x_nlc.shape
    assert C % num_heads == 0, "embed dim must be divisible by num_heads"
    D = C // num_heads
    dt = x_nlc.dtype
    f32 = jnp.float32
    hi = jax.lax.Precision.HIGHEST
    scale = 1.0 / math.sqrt(D)

    # One-time host prep: fuse chained projections, fold the softmax scale into the q path,
    # pre-transpose so in-kernel matmuls are `x @ W`, keep weights in the activation dtype.
    wq_eff = (jnp.dot(params["wq"].T, params["wiq"].T, precision=hi) * scale).astype(dt)
    wk_eff = jnp.dot(params["wk"].T, params["wik"].T, precision=hi).astype(dt)
    wv_eff = jnp.dot(params["wv"].T, params["wiv"].T, precision=hi).astype(dt)
    wo_t = params["wo"].T.astype(dt)
    wffn_eff = jnp.dot(params["wfc1"].T, params["wfc2"].T, precision=hi).astype(dt)
    b_in = jnp.stack([params["biq"] * scale, params["bik"], params["biv"]]
                     ).astype(f32)[:, None, :]                                # (3, 1, C)
    bo = params["bo"].astype(f32)[None, :]                                    # (1, C)

    TQ = _pick_q_tile(L, max_q_tile)
    n_qt = L // TQ
    grid = (N, n_qt)

    w_spec = pl.BlockSpec((C, C), lambda b, qt: (0, 0))   # constant index -> VMEM-resident

    # Explicit VMEM budget: weights + double-buffered in/out slabs + f32 temporaries.
    isz = jnp.dtype(dt).itemsize
    w_bytes = 5 * C * C * isz + 4 * C * 4
    act_bytes = (2 * L * C + 2 * TQ * C) * isz
    tmp_bytes = (3 * L * C + 6 * TQ * C + 2 * TQ * L) * 4
    vmem_limit = int(min(max(2 * (w_bytes + act_bytes + tmp_bytes), 32 * 2**20), 64 * 2**20))

    flops = N * (6 * L * C * C + 4 * n_qt * L * C * C + 4 * L * L * C)
    cost = pl.CostEstimate(
        flops=int(flops),
        transcendentals=int(N * num_heads * L * L),
        bytes_accessed=int(2 * N * L * C * isz + w_bytes),
    )

    kernel = functools.partial(_transformer_layer_kernel, num_heads=num_heads, q_tile=TQ)
    return pl.pallas_call(
        kernel,
        out_shape=jax.ShapeDtypeStruct((N, L, C), dt),
        grid=grid,
        in_specs=[
            pl.BlockSpec((None, L, C), lambda b, qt: (b, 0, 0)),   # x: full seq, const over qt
            w_spec, w_spec, w_spec,                                # fused q/k/v weights
            pl.BlockSpec((3, 1, C), lambda b, qt: (0, 0, 0)),      # in-proj biases
            w_spec,                                                # out-proj weight
            pl.BlockSpec((1, C), lambda b, qt: (0, 0)),            # out-proj bias
            w_spec,                                                # fused FFN weight
        ],
        out_specs=pl.BlockSpec((None, TQ, C), lambda b, qt: (b, qt, 0)),
        compiler_params=pltpu.CompilerParams(
            dimension_semantics=("parallel", "parallel"),
            vmem_limit_bytes=vmem_limit,
        ),
        cost_estimate=cost,
    )(x_nlc, wq_eff, wk_eff, wv_eff, b_in, wo_t, bo, wffn_eff)


def transformer_layer(x, params, num_heads, *, max_q_tile=256):
    """x: (L, N, C) — PyTorch nn.MultiheadAttention default layout.

    Callers that already hold batch-major activations should use
    transformer_layer_batch_major() directly: the two transposes here are a full
    HBM round-trip of the activation tensor."""
    out_b = transformer_layer_batch_major(
        jnp.transpose(x, (1, 0, 2)), params, num_heads, max_q_tile=max_q_tile)
    return jnp.transpose(out_b, (1, 0, 2))


def _transformer_layer_ref(x, params, num_heads):
    """Pure-JAX reference mirroring the PyTorch forward exactly."""
    L, N, C = x.shape
    D = C // num_heads
    q = x @ params["wq"].T @ params["wiq"].T + params["biq"]
    k = x @ params["wk"].T @ params["wik"].T + params["bik"]
    v = x @ params["wv"].T @ params["wiv"].T + params["biv"]

    def heads(t):  # (L, N, C) -> (N, H, L, D)
        return t.reshape(L, N, num_heads, D).transpose(1, 2, 0, 3)

    qh, kh, vh = heads(q), heads(k), heads(v)
    s = jnp.einsum("nhld,nhmd->nhlm", qh, kh) / math.sqrt(D)
    p = jax.nn.softmax(s, axis=-1)
    o = jnp.einsum("nhlm,nhmd->nhld", p, vh)                   # (N, H, L, D)
    o = o.transpose(2, 0, 1, 3).reshape(L, N, C)
    o = o @ params["wo"].T + params["bo"]
    x1 = o + x
    return x1 @ params["wfc1"].T @ params["wfc2"].T + x1


if __name__ == "__main__":
    L, N, C, H = 8, 2, 32, 4          # seq, batch, embed, heads (head_dim = 8)
    keys = jax.random.split(jax.random.PRNGKey(0), 14)

    def lin(k):
        return jax.random.uniform(k, (C, C), jnp.float32, -1.0, 1.0) / math.sqrt(C)

    params = {
        "wq": lin(keys[0]), "wk": lin(keys[1]), "wv": lin(keys[2]),
        "wiq": lin(keys[3]), "wik": lin(keys[4]), "wiv": lin(keys[5]),
        "biq": jax.random.uniform(keys[6], (C,), jnp.float32, -0.1, 0.1),
        "bik": jax.random.uniform(keys[7], (C,), jnp.float32, -0.1, 0.1),
        "biv": jax.random.uniform(keys[8], (C,), jnp.float32, -0.1, 0.1),
        "wo": lin(keys[9]),
        "bo": jax.random.uniform(keys[10], (C,), jnp.float32, -0.1, 0.1),
        "wfc1": lin(keys[11]), "wfc2": lin(keys[12]),
    }
    x = jax.random.normal(keys[13], (L, N, C), dtype=jnp.float32)

    fwd = jax.jit(functools.partial(transformer_layer, num_heads=H))
    out = jax.block_until_ready(fwd(x, params))

    with jax.default_matmul_precision("highest"):
        ref = _transformer_layer_ref(x, params, num_heads=H)

    assert out.shape == (L, N, C), out.shape
    assert out.dtype == x.dtype
    err = float(jnp.max(jnp.abs(out - ref)))
    assert err < 2e-3, f"max abs err {err}"

    # Also exercise the query-tiled path (L=16 split into 2 tiles of 8 rows).
    L2 = 16
    x2 = jax.random.normal(jax.random.PRNGKey(1), (L2, N, C), dtype=jnp.float32)
    fwd2 = jax.jit(functools.partial(transformer_layer, num_heads=H, max_q_tile=8))
    out2 = jax.block_until_ready(fwd2(x2, params))
    with jax.default_matmul_precision("highest"):
        ref2 = _transformer_layer_ref(x2, params, num_heads=H)
    err2 = float(jnp.max(jnp.abs(out2 - ref2)))
    assert err2 < 2e-3, f"tiled max abs err {err2}"

    print("KERNEL_OK")
</pallas_src>

<mosaic_0001>
module attributes {stable_mosaic.version = 11 : i64} {
  func.func @_transformer_layer_kernel(%arg0: i32, %arg1: i32, %arg2: memref<1x8x32xf32, #tpu.memory_space<vmem>>, %arg3: memref<32x32xf32, #tpu.memory_space<vmem>>, %arg4: memref<32x32xf32, #tpu.memory_space<vmem>>, %arg5: memref<32x32xf32, #tpu.memory_space<vmem>>, %arg6: memref<3x1x32xf32, #tpu.memory_space<vmem>>, %arg7: memref<32x32xf32, #tpu.memory_space<vmem>>, %arg8: memref<1x32xf32, #tpu.memory_space<vmem>>, %arg9: memref<32x32xf32, #tpu.memory_space<vmem>>, %arg10: memref<1x8x32xf32, #tpu.memory_space<vmem>>) attributes {dimension_semantics = [#tpu.dimension_semantics<parallel>, #tpu.dimension_semantics<parallel>], iteration_bounds = array<i64: 2, 1>, scalar_prefetch = 0 : i64, scratch_operands = 0 : i64, tpu.core_type = #tpu.core_type<tc>, window_params = [{transform_indices = @transform_0, window_bounds = array<i64: 1, 8, 32>}, {pipeline_mode = #tpu.pipeline_mode<synchronous>, transform_indices = @transform_1, window_bounds = array<i64: 32, 32>}, {pipeline_mode = #tpu.pipeline_mode<synchronous>, transform_indices = @transform_2, window_bounds = array<i64: 32, 32>}, {pipeline_mode = #tpu.pipeline_mode<synchronous>, transform_indices = @transform_3, window_bounds = array<i64: 32, 32>}, {pipeline_mode = #tpu.pipeline_mode<synchronous>, transform_indices = @transform_4, window_bounds = array<i64: 3, 1, 32>}, {pipeline_mode = #tpu.pipeline_mode<synchronous>, transform_indices = @transform_5, window_bounds = array<i64: 32, 32>}, {pipeline_mode = #tpu.pipeline_mode<synchronous>, transform_indices = @transform_6, window_bounds = array<i64: 1, 32>}, {pipeline_mode = #tpu.pipeline_mode<synchronous>, transform_indices = @transform_7, window_bounds = array<i64: 32, 32>}, {transform_indices = @transform_8, window_bounds = array<i64: 1, 8, 32>}]} {
    %c8_i32 = arith.constant 8 : i32
    %0 = arith.muli %arg1, %c8_i32 : i32
    %1 = tpu.assume_multiple %0, 8 : i32
    %c0 = arith.constant 0 : index
    %c0_0 = arith.constant 0 : index
    %c0_1 = arith.constant 0 : index
    %2 = vector.load %arg2[%c0, %c0_0, %c0_1] : memref<1x8x32xf32, #tpu.memory_space<vmem>>, vector<1x8x32xf32>
    %3 = vector.shape_cast %2 : vector<1x8x32xf32> to vector<8x32xf32>
    %c0_2 = arith.constant 0 : index
    %4 = arith.index_cast %1 : i32 to index
    %c0_3 = arith.constant 0 : index
    %5 = vector.load %arg2[%c0_2, %4, %c0_3] : memref<1x8x32xf32, #tpu.memory_space<vmem>>, vector<1x8x32xf32>
    %6 = vector.shape_cast %5 : vector<1x8x32xf32> to vector<8x32xf32>
    %c0_4 = arith.constant 0 : index
    %c0_5 = arith.constant 0 : index
    %7 = vector.load %arg3[%c0_4, %c0_5] : memref<32x32xf32, #tpu.memory_space<vmem>>, vector<32x32xf32>
    %cst = arith.constant dense<0.000000e+00> : vector<8x32xf32>
    %8 = tpu.matmul %6, %7, %cst {dimension_numbers = #tpu.dot_dimension_numbers<[1], [0], [0], [1], [0, 0, 1, 1], [], []>} : vector<8x32xf32>, vector<32x32xf32>, vector<8x32xf32> -> vector<8x32xf32>
    %c0_6 = arith.constant 0 : index
    %c0_7 = arith.constant 0 : index
    %c0_8 = arith.constant 0 : index
    %9 = vector.load %arg6[%c0_6, %c0_7, %c0_8] : memref<3x1x32xf32, #tpu.memory_space<vmem>>, vector<1x1x32xf32>
    %10 = vector.shape_cast %9 : vector<1x1x32xf32> to vector<1x32xf32>
    %11 = vector.broadcast %10 : vector<1x32xf32> to vector<8x32xf32>
    %12 = arith.addf %8, %11 : vector<8x32xf32>
    %c0_9 = arith.constant 0 : index
    %c0_10 = arith.constant 0 : index
    %13 = vector.load %arg4[%c0_9, %c0_10] : memref<32x32xf32, #tpu.memory_space<vmem>>, vector<32x32xf32>
    %cst_11 = arith.constant dense<0.000000e+00> : vector<8x32xf32>
    %14 = tpu.matmul %3, %13, %cst_11 {dimension_numbers = #tpu.dot_dimension_numbers<[1], [0], [0], [1], [0, 0, 1, 1], [], []>} : vector<8x32xf32>, vector<32x32xf32>, vector<8x32xf32> -> vector<8x32xf32>
    %c1 = arith.constant 1 : index
    %c0_12 = arith.constant 0 : index
    %c0_13 = arith.constant 0 : index
    %15 = vector.load %arg6[%c1, %c0_12, %c0_13] : memref<3x1x32xf32, #tpu.memory_space<vmem>>, vector<1x1x32xf32>
    %16 = vector.shape_cast %15 : vector<1x1x32xf32> to vector<1x32xf32>
    %17 = vector.broadcast %16 : vector<1x32xf32> to vector<8x32xf32>
    %18 = arith.addf %14, %17 : vector<8x32xf32>
    %c0_14 = arith.constant 0 : index
    %c0_15 = arith.constant 0 : index
    %19 = vector.load %arg5[%c0_14, %c0_15] : memref<32x32xf32, #tpu.memory_space<vmem>>, vector<32x32xf32>
    %cst_16 = arith.constant dense<0.000000e+00> : vector<8x32xf32>
    %20 = tpu.matmul %3, %19, %cst_16 {dimension_numbers = #tpu.dot_dimension_numbers<[1], [0], [0], [1], [0, 0, 1, 1], [], []>} : vector<8x32xf32>, vector<32x32xf32>, vector<8x32xf32> -> vector<8x32xf32>
    %c2 = arith.constant 2 : index
    %c0_17 = arith.constant 0 : index
    %c0_18 = arith.constant 0 : index
    %21 = vector.load %arg6[%c2, %c0_17, %c0_18] : memref<3x1x32xf32, #tpu.memory_space<vmem>>, vector<1x1x32xf32>
    %22 = vector.shape_cast %21 : vector<1x1x32xf32> to vector<1x32xf32>
    %23 = vector.broadcast %22 : vector<1x32xf32> to vector<8x32xf32>
    %24 = arith.addf %20, %23 : vector<8x32xf32>
    %c0_19 = arith.constant 0 : index
    %c0_20 = arith.constant 0 : index
    %25 = vector.load %arg8[%c0_19, %c0_20] : memref<1x32xf32, #tpu.memory_space<vmem>>, vector<1x32xf32>
    %26 = vector.broadcast %25 : vector<1x32xf32> to vector<8x32xf32>
    %27 = arith.addf %6, %26 : vector<8x32xf32>
    %28 = vector.extract_strided_slice %12 {offsets = [0, 0], sizes = [8, 8], strides = [1, 1]} : vector<8x32xf32> to vector<8x8xf32>
    %29 = vector.extract_strided_slice %18 {offsets = [0, 0], sizes = [8, 8], strides = [1, 1]} : vector<8x32xf32> to vector<8x8xf32>
    %30 = vector.extract_strided_slice %24 {offsets = [0, 0], sizes = [8, 8], strides = [1, 1]} : vector<8x32xf32> to vector<8x8xf32>
    %cst_21 = arith.constant dense<0.000000e+00> : vector<8x8xf32>
    %31 = tpu.matmul %28, %29, %cst_21 {dimension_numbers = #tpu.dot_dimension_numbers<[1], [1], [0], [0], [0, 0, 1, 0], [], []>} : vector<8x8xf32>, vector<8x8xf32>, vector<8x8xf32> -> vector<8x8xf32>
    %cst_22 = arith.constant dense<0xFF800000> : vector<8xf32>
    %32 = vector.multi_reduction <maximumf>, %31, %cst_22 [1] : vector<8x8xf32> to vector<8xf32>
    %33 = vector.shape_cast %32 : vector<8xf32> to vector<8x1xf32>
    %34 = vector.broadcast %33 : vector<8x1xf32> to vector<8x8xf32>
    %35 = arith.subf %31, %34 : vector<8x8xf32>
    %36 = math.exp %35 : vector<8x8xf32>
    %cst_23 = arith.constant dense<0.000000e+00> : vector<8xf32>
    %37 = vector.multi_reduction <add>, %36, %cst_23 [1] : vector<8x8xf32> to vector<8xf32>
    %38 = vector.shape_cast %37 : vector<8xf32> to vector<8x1xf32>
    %39 = tpu.reciprocal %38 : vector<8x1xf32> -> vector<8x1xf32>
    %cst_24 = arith.constant dense<0.000000e+00> : vector<8x8xf32>
    %40 = tpu.matmul %36, %30, %cst_24 {dimension_numbers = #tpu.dot_dimension_numbers<[1], [0], [0], [1], [0, 0, 1, 1], [], []>} : vector<8x8xf32>, vector<8x8xf32>, vector<8x8xf32> -> vector<8x8xf32>
    %41 = vector.broadcast %39 : vector<8x1xf32> to vector<8x8xf32>
    %42 = arith.mulf %40, %41 : vector<8x8xf32>
    %c0_25 = arith.constant 0 : index
    %c0_26 = arith.constant 0 : index
    %43 = vector.load %arg7[%c0_25, %c0_26] : memref<32x32xf32, #tpu.memory_space<vmem>>, vector<8x32xf32>
    %cst_27 = arith.constant dense<0.000000e+00> : vector<8x32xf32>
    %44 = tpu.matmul %42, %43, %cst_27 {dimension_numbers = #tpu.dot_dimension_numbers<[1], [0], [0], [1], [0, 0, 1, 1], [], []>} : vector<8x8xf32>, vector<8x32xf32>, vector<8x32xf32> -> vector<8x32xf32>
    %45 = arith.addf %27, %44 : vector<8x32xf32>
    %46 = vector.extract_strided_slice %12 {offsets = [0, 8], sizes = [8, 8], strides = [1, 1]} : vector<8x32xf32> to vector<8x8xf32>
    %47 = vector.extract_strided_slice %18 {offsets = [0, 8], sizes = [8, 8], strides = [1, 1]} : vector<8x32xf32> to vector<8x8xf32>
    %48 = vector.extract_strided_slice %24 {offsets = [0, 8], sizes = [8, 8], strides = [1, 1]} : vector<8x32xf32> to vector<8x8xf32>
    %cst_28 = arith.constant dense<0.000000e+00> : vector<8x8xf32>
    %49 = tpu.matmul %46, %47, %cst_28 {dimension_numbers = #tpu.dot_dimension_numbers<[1], [1], [0], [0], [0, 0, 1, 0], [], []>} : vector<8x8xf32>, vector<8x8xf32>, vector<8x8xf32> -> vector<8x8xf32>
    %cst_29 = arith.constant dense<0xFF800000> : vector<8xf32>
    %50 = vector.multi_reduction <maximumf>, %49, %cst_29 [1] : vector<8x8xf32> to vector<8xf32>
    %51 = vector.shape_cast %50 : vector<8xf32> to vector<8x1xf32>
    %52 = vector.broadcast %51 : vector<8x1xf32> to vector<8x8xf32>
    %53 = arith.subf %49, %52 : vector<8x8xf32>
    %54 = math.exp %53 : vector<8x8xf32>
    %cst_30 = arith.constant dense<0.000000e+00> : vector<8xf32>
    %55 = vector.multi_reduction <add>, %54, %cst_30 [1] : vector<8x8xf32> to vector<8xf32>
    %56 = vector.shape_cast %55 : vector<8xf32> to vector<8x1xf32>
    %57 = tpu.reciprocal %56 : vector<8x1xf32> -> vector<8x1xf32>
    %cst_31 = arith.constant dense<0.000000e+00> : vector<8x8xf32>
    %58 = tpu.matmul %54, %48, %cst_31 {dimension_numbers = #tpu.dot_dimension_numbers<[1], [0], [0], [1], [0, 0, 1, 1], [], []>} : vector<8x8xf32>, vector<8x8xf32>, vector<8x8xf32> -> vector<8x8xf32>
    %59 = vector.broadcast %57 : vector<8x1xf32> to vector<8x8xf32>
    %60 = arith.mulf %58, %59 : vector<8x8xf32>
    %c8 = arith.constant 8 : index
    %c0_32 = arith.constant 0 : index
    %61 = vector.load %arg7[%c8, %c0_32] : memref<32x32xf32, #tpu.memory_space<vmem>>, vector<8x32xf32>
    %cst_33 = arith.constant dense<0.000000e+00> : vector<8x32xf32>
    %62 = tpu.matmul %60, %61, %cst_33 {dimension_numbers = #tpu.dot_dimension_numbers<[1], [0], [0], [1], [0, 0, 1, 1], [], []>} : vector<8x8xf32>, vector<8x32xf32>, vector<8x32xf32> -> vector<8x32xf32>
    %63 = arith.addf %45, %62 : vector<8x32xf32>
    %64 = vector.extract_strided_slice %12 {offsets = [0, 16], sizes = [8, 8], strides = [1, 1]} : vector<8x32xf32> to vector<8x8xf32>
    %65 = vector.extract_strided_slice %18 {offsets = [0, 16], sizes = [8, 8], strides = [1, 1]} : vector<8x32xf32> to vector<8x8xf32>
    %66 = vector.extract_strided_slice %24 {offsets = [0, 16], sizes = [8, 8], strides = [1, 1]} : vector<8x32xf32> to vector<8x8xf32>
    %cst_34 = arith.constant dense<0.000000e+00> : vector<8x8xf32>
    %67 = tpu.matmul %64, %65, %cst_34 {dimension_numbers = #tpu.dot_dimension_numbers<[1], [1], [0], [0], [0, 0, 1, 0], [], []>} : vector<8x8xf32>, vector<8x8xf32>, vector<8x8xf32> -> vector<8x8xf32>
    %cst_35 = arith.constant dense<0xFF800000> : vector<8xf32>
    %68 = vector.multi_reduction <maximumf>, %67, %cst_35 [1] : vector<8x8xf32> to vector<8xf32>
    %69 = vector.shape_cast %68 : vector<8xf32> to vector<8x1xf32>
    %70 = vector.broadcast %69 : vector<8x1xf32> to vector<8x8xf32>
    %71 = arith.subf %67, %70 : vector<8x8xf32>
    %72 = math.exp %71 : vector<8x8xf32>
    %cst_36 = arith.constant dense<0.000000e+00> : vector<8xf32>
    %73 = vector.multi_reduction <add>, %72, %cst_36 [1] : vector<8x8xf32> to vector<8xf32>
    %74 = vector.shape_cast %73 : vector<8xf32> to vector<8x1xf32>
    %75 = tpu.reciprocal %74 : vector<8x1xf32> -> vector<8x1xf32>
    %cst_37 = arith.constant dense<0.000000e+00> : vector<8x8xf32>
    %76 = tpu.matmul %72, %66, %cst_37 {dimension_numbers = #tpu.dot_dimension_numbers<[1], [0], [0], [1], [0, 0, 1, 1], [], []>} : vector<8x8xf32>, vector<8x8xf32>, vector<8x8xf32> -> vector<8x8xf32>
    %77 = vector.broadcast %75 : vector<8x1xf32> to vector<8x8xf32>
    %78 = arith.mulf %76, %77 : vector<8x8xf32>
    %c16 = arith.constant 16 : index
    %c0_38 = arith.constant 0 : index
    %79 = vector.load %arg7[%c16, %c0_38] : memref<32x32xf32, #tpu.memory_space<vmem>>, vector<8x32xf32>
    %cst_39 = arith.constant dense<0.000000e+00> : vector<8x32xf32>
    %80 = tpu.matmul %78, %79, %cst_39 {dimension_numbers = #tpu.dot_dimension_numbers<[1], [0], [0], [1], [0, 0, 1, 1], [], []>} : vector<8x8xf32>, vector<8x32xf32>, vector<8x32xf32> -> vector<8x32xf32>
    %81 = arith.addf %63, %80 : vector<8x32xf32>
    %82 = vector.extract_strided_slice %12 {offsets = [0, 24], sizes = [8, 8], strides = [1, 1]} : vector<8x32xf32> to vector<8x8xf32>
    %83 = vector.extract_strided_slice %18 {offsets = [0, 24], sizes = [8, 8], strides = [1, 1]} : vector<8x32xf32> to vector<8x8xf32>
    %84 = vector.extract_strided_slice %24 {offsets = [0, 24], sizes = [8, 8], strides = [1, 1]} : vector<8x32xf32> to vector<8x8xf32>
    %cst_40 = arith.constant dense<0.000000e+00> : vector<8x8xf32>
    %85 = tpu.matmul %82, %83, %cst_40 {dimension_numbers = #tpu.dot_dimension_numbers<[1], [1], [0], [0], [0, 0, 1, 0], [], []>} : vector<8x8xf32>, vector<8x8xf32>, vector<8x8xf32> -> vector<8x8xf32>
    %cst_41 = arith.constant dense<0xFF800000> : vector<8xf32>
    %86 = vector.multi_reduction <maximumf>, %85, %cst_41 [1] : vector<8x8xf32> to vector<8xf32>
    %87 = vector.shape_cast %86 : vector<8xf32> to vector<8x1xf32>
    %88 = vector.broadcast %87 : vector<8x1xf32> to vector<8x8xf32>
    %89 = arith.subf %85, %88 : vector<8x8xf32>
    %90 = math.exp %89 : vector<8x8xf32>
    %cst_42 = arith.constant dense<0.000000e+00> : vector<8xf32>
    %91 = vector.multi_reduction <add>, %90, %cst_42 [1] : vector<8x8xf32> to vector<8xf32>
    %92 = vector.shape_cast %91 : vector<8xf32> to vector<8x1xf32>
    %93 = tpu.reciprocal %92 : vector<8x1xf32> -> vector<8x1xf32>
    %cst_43 = arith.constant dense<0.000000e+00> : vector<8x8xf32>
    %94 = tpu.matmul %90, %84, %cst_43 {dimension_numbers = #tpu.dot_dimension_numbers<[1], [0], [0], [1], [0, 0, 1, 1], [], []>} : vector<8x8xf32>, vector<8x8xf32>, vector<8x8xf32> -> vector<8x8xf32>
    %95 = vector.broadcast %93 : vector<8x1xf32> to vector<8x8xf32>
    %96 = arith.mulf %94, %95 : vector<8x8xf32>
    %c24 = arith.constant 24 : index
    %c0_44 = arith.constant 0 : index
    %97 = vector.load %arg7[%c24, %c0_44] : memref<32x32xf32, #tpu.memory_space<vmem>>, vector<8x32xf32>
    %cst_45 = arith.constant dense<0.000000e+00> : vector<8x32xf32>
    %98 = tpu.matmul %96, %97, %cst_45 {dimension_numbers = #tpu.dot_dimension_numbers<[1], [0], [0], [1], [0, 0, 1, 1], [], []>} : vector<8x8xf32>, vector<8x32xf32>, vector<8x32xf32> -> vector<8x32xf32>
    %99 = arith.addf %81, %98 : vector<8x32xf32>
    %c0_46 = arith.constant 0 : index
    %c0_47 = arith.constant 0 : index
    %100 = vector.load %arg9[%c0_46, %c0_47] : memref<32x32xf32, #tpu.memory_space<vmem>>, vector<32x32xf32>
    %cst_48 = arith.constant dense<0.000000e+00> : vector<8x32xf32>
    %101 = tpu.matmul %99, %100, %cst_48 {dimension_numbers = #tpu.dot_dimension_numbers<[1], [0], [0], [1], [0, 0, 1, 1], [], []>} : vector<8x32xf32>, vector<32x32xf32>, vector<8x32xf32> -> vector<8x32xf32>
    %102 = arith.addf %101, %99 : vector<8x32xf32>
    %c0_49 = arith.constant 0 : index
    %c0_50 = arith.constant 0 : index
    %c0_51 = arith.constant 0 : index
    %103 = vector.load %arg10[%c0_49, %c0_50, %c0_51] : memref<1x8x32xf32, #tpu.memory_space<vmem>>, vector<1x8x32xf32>
    %104 = vector.shape_cast %103 : vector<1x8x32xf32> to vector<8x32xf32>
    %105 = vector.shape_cast %102 : vector<8x32xf32> to vector<1x8x32xf32>
    tpu.vector_store %arg10[%c0_49, %c0_50, %c0_51], %105 {strides = array<i32>} : memref<1x8x32xf32, #tpu.memory_space<vmem>>, vector<1x8x32xf32>,
    return
  }
  func.func @transform_0(%arg0: i32, %arg1: i32) -> (i32, i32, i32) {
    %c0_i32 = arith.constant 0 : i32
    %c0_i32_0 = arith.constant 0 : i32
    %c0_i32_1 = arith.constant 0 : i32
    return %arg0, %c0_i32, %c0_i32_0 : i32, i32, i32
  }
  func.func @transform_1(%arg0: i32, %arg1: i32) -> (i32, i32) {
    %c0_i32 = arith.constant 0 : i32
    %c0_i32_0 = arith.constant 0 : i32
    %c0_i32_1 = arith.constant 0 : i32
    return %c0_i32, %c0_i32_0 : i32, i32
  }
  func.func @transform_2(%arg0: i32, %arg1: i32) -> (i32, i32) {
    %c0_i32 = arith.constant 0 : i32
    %c0_i32_0 = arith.constant 0 : i32
    %c0_i32_1 = arith.constant 0 : i32
    return %c0_i32, %c0_i32_0 : i32, i32
  }
  func.func @transform_3(%arg0: i32, %arg1: i32) -> (i32, i32) {
    %c0_i32 = arith.constant 0 : i32
    %c0_i32_0 = arith.constant 0 : i32
    %c0_i32_1 = arith.constant 0 : i32
    return %c0_i32, %c0_i32_0 : i32, i32
  }
  func.func @transform_4(%arg0: i32, %arg1: i32) -> (i32, i32, i32) {
    %c0_i32 = arith.constant 0 : i32
    %c0_i32_0 = arith.constant 0 : i32
    %c0_i32_1 = arith.constant 0 : i32
    %c0_i32_2 = arith.constant 0 : i32
    return %c0_i32, %c0_i32_0, %c0_i32_1 : i32, i32, i32
  }
  func.func @transform_5(%arg0: i32, %arg1: i32) -> (i32, i32) {
    %c0_i32 = arith.constant 0 : i32
    %c0_i32_0 = arith.constant 0 : i32
    %c0_i32_1 = arith.constant 0 : i32
    return %c0_i32, %c0_i32_0 : i32, i32
  }
  func.func @transform_6(%arg0: i32, %arg1: i32) -> (i32, i32) {
    %c0_i32 = arith.constant 0 : i32
    %c0_i32_0 = arith.constant 0 : i32
    %c0_i32_1 = arith.constant 0 : i32
    return %c0_i32, %c0_i32_0 : i32, i32
  }
  func.func @transform_7(%arg0: i32, %arg1: i32) -> (i32, i32) {
    %c0_i32 = arith.constant 0 : i32
    %c0_i32_0 = arith.constant 0 : i32
    %c0_i32_1 = arith.constant 0 : i32
    return %c0_i32, %c0_i32_0 : i32, i32
  }
  func.func @transform_8(%arg0: i32, %arg1: i32) -> (i32, i32, i32) {
    %c0_i32 = arith.constant 0 : i32
    %c0_i32_0 = arith.constant 0 : i32
    return %arg0, %arg1, %c0_i32 : i32, i32, i32
  }
}

</mosaic_0001>

<bundles_post_ra>
// kernel: transformer_layer.1
= control target key start
LH: loop header
LB: loop body
LE: loop exit
PB: predicated region body
PF: predicated region fallthrough
CT: control target
= control target key end

     0   :  { %s2028_s27 = smov 0   ;;  %s2030_s28 = smov 0   ;;  %s2243_s0 = inlined_call_operand.vmem [shape: f32[2,8,32], index: 0, kind: input, shape index: {}]   ;;  %s2244_s1 = inlined_call_operand.vmem [shape: f32[32,32], index: 1, kind: input, shape index: {}]   ;;  %s2245_s2 = inlined_call_operand.vmem [shape: f32[32,32], index: 2, kind: input, shape index: {}]   ;;  %s2246_s3 = inlined_call_operand.vmem [shape: f32[32,32], index: 3, kind: input, shape index: {}]   ;;  %s2247_s4 = inlined_call_operand.vmem [shape: f32[3,1,32], index: 4, kind: input, shape index: {}]   ;;  %s2248_s5 = inlined_call_operand.vmem [shape: f32[32,32], index: 5, kind: input, shape index: {}]   ;;  %s2249_s6 = inlined_call_operand.vmem [shape: f32[1,32], index: 6, kind: input, shape index: {}]   ;;  %s2250_s7 = inlined_call_operand.vmem [shape: f32[32,32], index: 7, kind: input, shape index: {}]   ;;  %s2251_s8 = inlined_call_operand.vmem [shape: f32[2,8,32], index: 8, kind: output, shape index: {}]  }
   0x1   :  { %s2032_s29 = smov 0  }
   0x2 LB: > { %s30_s30 = sadd.s32 1, %s1971_s28  ;;  %p1697_p0 = scmp.ge.s32.totalorder %s1975_s29, 1  ;;  %s1975_s29 = sphi %s2032_s29, %s18_s29   ;;  %s1971_s28 = sphi %s2030_s28, %s2253_s28   ;;  %s1967_s27 = sphi %s2028_s27, %s2252_s27  }
   0x3   : > { %p32_p1 = scmp.ge.s32.totalorder %s30_s30, 2  ;;  %p275_p2 = scmp.lt.s32.totalorder %s1975_s29, 3 }
   0x5   : > { %s2255_s30 = smov (%p32_p1, %s30_s30), 0  ;;  %p276_p3 = pnand %p1697_p0, %p275_p2 }
   0x6   : > { %v325_v0 = vld [vmem:[%s2244_s1] sm:$0xff] (!%p276_p3)  ;;  %v326_v1 = vld [vmem:[%s2244_s1 + $0x8] sm:$0xff] (!%p276_p3)  ;;  %v1977_v3 = vmov (!%p276_p3), 0.0|0.0   ;;  %v327_v6 = vld [vmem:[%s2244_s1 + $0x10] sm:$0xff] (!%p276_p3)  ;;  %p310_p4 = scmp.lt.s32.totalorder (!%p276_p3), %s1967_s27, 1  ;;  %vm1978_vm0 = vmmov (!%p276_p3), 0  }
   0x7   : > { %279 = sbr.rel (%p276_p3) target bundleno = 2000 (0x7d0), region = 52  ;;  %v410_v2 = vld [vmem:[%s2245_s2] sm:$0xff] (!%p276_p3)  ;;  %1876 = vmatprep.subr.bf16.mxu0 (!%p276_p3), %v1977_v3  ;;  %1882 = vmatprep.subr.bf16.mxu1 (!%p276_p3), %v1977_v3  ;;  %v1877_v4 = vpack.c.bf16 (!%p276_p3), %v326_v1, %v325_v0  ;;  %v411_v5 = vld [vmem:[%s2245_s2 + $0x8] sm:$0xff] (!%p276_p3)  ;;  %v328_v7 = vld [vmem:[%s2244_s1 + $0x18] sm:$0xff] (!%p276_p3)  ;;  %v1979_v11 = vmov (!%p276_p3), 0.0   ;;  %vm336_vm1 = vcmask (!%p276_p3), 261120  }
   0x8   : > { %v1883_v8 = vpack.c.bf16 (!%p276_p3), %v411_v5, %v410_v2  ;;  %v412_v9 = vld [vmem:[%s2245_s2 + $0x10] sm:$0xff] (!%p276_p3)  ;;  %v413_v10 = vld [vmem:[%s2245_s2 + $0x18] sm:$0xff] (!%p276_p3)  ;;  %1780 = vmatprep.mubr.msk.f32.mxu0 (!%p276_p3), %vm1978_vm0, %v1979_v11  ;;  %1791 = vmatprep.mubr.msk.f32.mxu1 (!%p276_p3), %vm1978_vm0, %v1979_v11  ;;  %v1880_v12 = vpack.c.bf16 (!%p276_p3), %v328_v7, %v327_v6  ;;  %v495_v15 = vld [vmem:[%s2246_s3] sm:$0xff] (!%p276_p3)  ;;  %vm585_vm2 = vcmask (!%p276_p3), 64512   ;;  %s1980_s23 = smov (!%p276_p3), 120   ;;  %s1981_s24 = smov (!%p276_p3), 112  }
   0x9   : > { %1878 = vmatpush3.bf16.msra.mxu0 (!%p276_p3), %v1877_v4  ;;  %v1886_v13 = vpack.c.bf16 (!%p276_p3), %v413_v10, %v412_v9  ;;  %v496_v16 = vld [vmem:[%s2246_s3 + $0x8] sm:$0xff] (!%p276_p3)  ;;  %v497_v17 = vld [vmem:[%s2246_s3 + $0x10] sm:$0xff] (!%p276_p3)  ;;  %v498_v19 = vld [vmem:[%s2246_s3 + $0x18] sm:$0xff] (!%p276_p3) }
   0xa   : > { %1884 = vmatpush3.bf16.msra.mxu1 (!%p276_p3), %v1883_v8  ;;  %1879 = vmatprep.subr.bf16.mxu0 (!%p276_p3), %v1977_v3  ;;  %v1889_v18 = vpack.c.bf16 (!%p276_p3), %v496_v16, %v495_v15  ;;  %v1892_v20 = vpack.c.bf16 (!%p276_p3), %v498_v19, %v497_v17  ;;  %v1700_v21 = vld [vmem:[%s2247_s4] ss:$0 sm:$0xff] (!%p276_p3)  ;;  %v1703_v22 = vld [vmem:[%s2247_s4 + $0x1] ss:$0 sm:$0xff] (!%p276_p3)  ;;  %v1706_v29 = vld [vmem:[%s2247_s4 + $0x2] ss:$0 sm:$0xff] (!%p276_p3) }
   0xb   : > { %1885 = vmatprep.subr.bf16.mxu1 (!%p276_p3), %v1977_v3  ;;  %v746_v46 = vld [vmem:[%s2248_s5] sm:$0xff] (!%p276_p3)  ;;  %v987_v8 = vld [vmem:[%s2248_s5 + $0x8] sm:$0xff] (!%p276_p3) }
   0xd   : > { %1881 = vmatpush3.bf16.msra.mxu0 (!%p276_p3), %v1880_v12 }
   0xe   : > { %s2257_s27 = smov (!%p310_p4, %s1967_s27), 1  ;;  %1887 = vmatpush3.bf16.msra.mxu1 %v1886_v13  ;;  %1888 = vmatprep.subr.bf16.mxu0 %v1977_v3 }
   0xf   : > { %s1698_s25 = sshll.u32 %s2257_s27, 3  ;;  %1805 = vmatprep.subr.mxu1 %v1979_v11 }
  0x10   : > { %s313_s10 = scalar_lea.vmem %s2243_s0, %s1698_s25  ;;  %s320_s14 = scalar_lea.vmem %s2251_s8, %s1698_s25 }
  0x11   : > { %v2090_v14 = vld [vmem:[%s313_s10] sm:$0xff]  ;;  %s1982_s10 = smov 104  }
  0x12   : > { %1781 = vmatmul.mubr.msk.f32.vlgmr.msra.gmra.mrb[0].mxu0 %vm336_vm1, %v2090_v14  ;;  %1792 = vmatmul.mubr.msk.f32.vlgmr.msra.gmra.mrb[0].mxu1 %vm336_vm1, %v2090_v14 }
  0x13   : > { %1802 = vmatprep.mubr.msk.f32.mxu0 %vm1978_vm0, %v1979_v11  ;;  %1807 = vmatprep.mubr.msk.f32.mxu1 %vm1978_vm0, %v1979_v11 }
  0x14   : > { %1890 = vmatpush3.bf16.msra.mxu0 %v1889_v18 }
  0x15   : > { %1891 = vmatprep.subr.bf16.mxu0 %v1977_v3 }
  0x18   : > { %1893 = vmatpush3.bf16.msra.mxu0 %v1892_v20 }
  0x19   : > { %1815 = vmatprep.subr.mxu0 %v1979_v11 }
  0x1b   : > { %1803 = vmatmul.mubr.msk.f32.vlgmr.msra.gmra.mrb[2].mxu0 %vm336_vm1, %v2090_v14 }
  0x1c   : > { %1817 = vmatprep.mubr.msk.f32.mxu0 %vm1978_vm0, %v1979_v11  ;;  %1816 = vmatpush3.msra.mxu0 %v746_v46 }
  0x1d   : > { %1825 = vmatprep.subr.mxu0 %v1979_v11 }
  0xe5   : > { %v406_v23 = vpop.f32.mrb[0].mxu0  ;;  %v491_v25 = vpop.f32.mrb[0].mxu1 }
  0xe6   : > { %v407_v24 = vadd.f32 %v1700_v21, %v406_v23  ;;  %v1782_v26 = vpop.f32.mrb[1].mxu0  ;;  %v492_v27 = vadd.f32 %v1703_v22, %v491_v25  ;;  %v1793_v28 = vpop.f32.mrb[1].mxu1  ;;  %v1227_v22 = vld [vmem:[%s2248_s5 + $0x10] sm:$0xff] }
  0xe8   : > { %821 = vrot.lane.b32.xlu1 %v407_v24, %s1980_s23  ;;  %1806 = vmatpush3.xpose.msk.msra.mxu1 %vm585_vm2, %v492_v27 }
  0xe9   : > { %1810 = vmatprep.subr.mxu1 %v1979_v11 }
  0xeb   : > { %1808 = vmatmul.mubr.msk.f32.vlgmr.msra.gmra.mrb[2].mxu1 %vm585_vm2, %v407_v24 }
  0xec   : > { %1064 = vrot.lane.b32.xlu1 %v492_v27, %s1981_s24  ;;  %1812 = vmatprep.mubr.msk.f32.mxu1 %vm1978_vm0, %v1979_v11 }
  0xee   : > { %v573_v30 = vpop.f32.mrb[2].mxu0 }
  0xef   : > { %v2135_v31 = vadd.f32 %v1706_v29, %v573_v30  ;;  %v1804_v32 = vpop.f32.mrb[3].mxu0 }
  0xf0   : > { %1062 = vrot.lane.b32.xlu1 %v407_v24, %s1981_s24  ;;  %v1542_v32 = vld [vmem:[%s2250_s7] sm:$0xff] }
  0xf1   : > { %1811 = vmatpush3.msra.mxu1 %v2135_v31 }
  0xf2   : > { %1820 = vmatprep.subr.mxu1 %v1979_v11 }
 0x15a   : > { %v822_v39 = vpop.permute.xlu1 %821 }
 0x15e   : > { %v1065_v43 = vpop.permute.xlu1 %1064 }
 0x162   : > { %v1063_v44 = vpop.permute.xlu1 %1062 }
 0x1be   : > { %v658_v33 = vpop.f32.mrb[2].mxu1 }
 0x1bf   : > { %v1809_v34 = vpop.f32.mrb[3].mxu1  ;;  %v662_v35 = vsel %vm585_vm2, %v658_v33, -inf }
 0x1c0   : > { %663 = vmax.xlane.f32.xlu0 %v662_v35 }
 0x1d6   : > { %823 = vrot.lane.b32.xlu0 %v492_v27, %s1980_s23 }
 0x1da   : > { %1150 = vrot.lane.b32.xlu0 %v2135_v31, %s1981_s24 }
 0x1de   : > { %1304 = vrot.lane.b32.xlu0 %v492_v27, %s1982_s10 }
 0x1e2   : > { %1302 = vrot.lane.b32.xlu0 %v407_v24, %s1982_s10 }
 0x24d   : > { %v664_v36 = vpop.xlane.xlu0 %663 }
 0x24e   : > { %v665_v37 = vsub.f32 %v658_v33, %v664_v36  ;;  %v1543_v33 = vld [vmem:[%s2250_s7 + $0x8] sm:$0xff] }
 0x24f   : > { %v1895_v34 = vpack.c.bf16 %v1543_v33, %v1542_v32 }
 0x250   : > { %v666_v38 = vmul.f32 1.442695, %v665_v37 }
 0x251   : > { %v824_v41 = vpop.permute.xlu0 %823 }
 0x252   : > { %1937 = vpow2.f32 %v666_v38 }
 0x255   : > { %v1151_v45 = vpop.permute.xlu0 %1150 }
 0x259   : > { %v1305_v47 = vpop.permute.xlu0 %1304 }
 0x25c   : > { %v1938_v40 = vpop.eup %1937 }
 0x25d   : > { %1813 = vmatmul.mubr.msk.f32.vlgmr.msra.gmra.mrb[4].mxu1 %vm585_vm2, %v1938_v40  ;;  %v668_v42 = vsel %vm585_vm2, %v1938_v40, 0.0  ;;  %v1303_v48 = vpop.permute.xlu0 %1302  ;;  %v1545_v40 = vld [vmem:[%s2250_s7 + $0x18] sm:$0xff] }
 0x25e   : > { %1821 = vmatpush3.xpose.msk.msra.mxu1 %vm585_vm2, %v824_v41  ;;  %669 = vadd.xlane.f32.xlu0 %v668_v42 }
 0x25f   : > { %1822 = vmatprep.mubr.msk.f32.mxu1 %vm1978_vm0, %v1979_v11  ;;  %1835 = vmatprep.subr.mxu1 %v1979_v11 }
 0x261   : > { %1823 = vmatmul.mubr.msk.f32.vlgmr.msra.gmra.mrb[6].mxu1 %vm585_vm2, %v822_v39  ;;  %v1544_v39 = vld [vmem:[%s2250_s7 + $0x10] sm:$0xff] }
 0x262   : > { %1836 = vmatpush3.xpose.msk.msra.mxu1 %vm585_vm2, %v1065_v43  ;;  %1837 = vmatprep.mubr.msk.f32.mxu1 %vm1978_vm0, %v1979_v11  ;;  %v1898_v41 = vpack.c.bf16 %v1545_v40, %v1544_v39 }
 0x263   : > { %1840 = vmatprep.subr.mxu1 %v1979_v11 }
 0x265   : > { %1838 = vmatmul.mubr.msk.f32.vlgmr.msra.gmra.mrb[8].mxu1 %vm585_vm2, %v1063_v44 }
 0x266   : > { %1841 = vmatpush3.msra.mxu1 %v1151_v45  ;;  %1842 = vmatprep.mubr.msk.f32.mxu1 %vm1978_vm0, %v1979_v11 }
 0x267   : > { %1850 = vmatprep.subr.mxu1 %v1979_v11 }
 0x2eb   : > { %v670_v49 = vpop.xlane.xlu0 %669 }
 0x2ec   : > { %1939 = vrcp.f32 %v670_v49 }
 0x2f6   : > { %v1940_v50 = vpop.eup %1939 }
 0x330   : > { %v741_v51 = vpop.f32.mrb[4].mxu1 }
 0x331   : > { %v745_v52 = vmul.f32 %v1940_v50, %v741_v51  ;;  %v1814_v53 = vpop.f32.mrb[5].mxu1 }
 0x333   : > { %1818 = vmatmul.mubr.msk.f32.vlgmr.msra.gmra.mrb[4].mxu0 %vm585_vm2, %v745_v52 }
 0x334   : > { %v895_v54 = vpop.f32.mrb[6].mxu1  ;;  %1827 = vmatprep.mubr.msk.f32.mxu0 %vm1978_vm0, %v1979_v11 }
 0x335   : > { %v1824_v55 = vpop.f32.mrb[7].mxu1  ;;  %v899_v59 = vsel %vm585_vm2, %v895_v54, -inf }
 0x338   : > { %v1136_v56 = vpop.f32.mrb[8].mxu1 }
 0x339   : > { %v1839_v57 = vpop.f32.mrb[9].mxu1  ;;  %v1140_v58 = vsel %vm585_vm2, %v1136_v56, -inf }
 0x33a   : > { %1141 = vmax.xlane.f32.xlu1 %v1140_v58 }
 0x33e   : > { %900 = vmax.xlane.f32.xlu1 %v899_v59 }
 0x34f   : > { %910 = vrot.lane.b32.xlu1 %v2135_v31, %s1980_s23 }
 0x3c7   : > { %v1142_v60 = vpop.xlane.xlu1 %1141 }
 0x3c8   : > { %v1143_v61 = vsub.f32 %v1136_v56, %v1142_v60 }
 0x3ca   : > { %v1144_v62 = vmul.f32 1.442695, %v1143_v61 }
 0x3cb   : > { %v901_v63 = vpop.xlane.xlu1 %900 }
 0x3cc   : > { %1941 = vpow2.f32 %v1144_v62  ;;  %v902_v0 = vsub.f32 %v895_v54, %v901_v63 }
 0x3ce   : > { %v903_v1 = vmul.f32 1.442695, %v902_v0 }
 0x3cf   : > { %v911_v2 = vpop.permute.xlu1 %910 }
 0x3d0   : > { %1943 = vpow2.f32 %v903_v1  ;;  %1826 = vmatpush3.msra.mxu0 %v911_v2 }
 0x3d1   : > { %1830 = vmatprep.subr.mxu0 %v1979_v11 }
 0x3d6   : > { %v1942_v4 = vpop.eup %1941 }
 0x3d7   : > { %1843 = vmatmul.mubr.msk.f32.vlgmr.msra.gmra.mrb[10].mxu1 %vm585_vm2, %v1942_v4  ;;  %v1146_v5 = vsel %vm585_vm2, %v1942_v4, 0.0 }
 0x3d8   : > { %1851 = vmatpush3.xpose.msk.msra.mxu1 %vm585_vm2, %v1305_v47  ;;  %1147 = vadd.xlane.f32.xlu1 %v1146_v5 }
 0x3d9   : > { %1852 = vmatprep.mubr.msk.f32.mxu1 %vm1978_vm0, %v1979_v11  ;;  %1894 = vmatprep.subr.bf16.mxu1 %v1977_v3 }
 0x3da   : > { %v1944_v6 = vpop.eup %1943 }
 0x3db   : > { %1828 = vmatmul.mubr.msk.f32.vlgmr.msra.gmra.mrb[6].mxu0 %vm585_vm2, %v1944_v6  ;;  %1853 = vmatmul.mubr.msk.f32.vlgmr.msra.gmra.mrb[12].mxu1 %vm585_vm2, %v1303_v48  ;;  %v905_v7 = vsel %vm585_vm2, %v1944_v6, 0.0 }
 0x3dc   : > { %906 = vadd.xlane.f32.xlu0 %v905_v7  ;;  %1832 = vmatprep.mubr.msk.f32.mxu0 %vm1978_vm0, %v1979_v11 }
 0x3dd   : > { %1873 = vmatprep.mubr.msk.f32.mxu1 %vm1978_vm0, %v1979_v11  ;;  %1831 = vmatpush3.msra.mxu0 %v987_v8 }
 0x3de   : > { %1845 = vmatprep.subr.mxu0 %v1979_v11  ;;  %1896 = vmatpush3.bf16.msra.mxu1 %v1895_v34 }
 0x3df   : > { %1897 = vmatprep.subr.bf16.mxu1 %v1977_v3  ;;  %v1708_v3 = vld [vmem:[%s2249_s6] ss:$0 sm:$0xff] }
 0x3e0   : > { %v584_v42 = vadd.f32 %v1708_v3, %v2090_v14 }
 0x3e2   : > { %1899 = vmatpush3.bf16.msra.mxu1 %v1898_v41 }
 0x465   : > { %v1148_v10 = vpop.xlane.xlu1 %1147 }
 0x469   : > { %v907_v9 = vpop.xlane.xlu0 %906 }
 0x46a   : > { %1945 = vrcp.f32 %v907_v9 }
 0x46b   : > { %1947 = vrcp.f32 %v1148_v10 }
 0x474   : > { %v1946_v15 = vpop.eup %1945 }
 0x475   : > { %v1948_v23 = vpop.eup %1947 }
 0x4aa   : > { %v1222_v12 = vpop.f32.mrb[10].mxu1 }
 0x4ab   : > { %v1844_v13 = vpop.f32.mrb[11].mxu1  ;;  %v1226_v24 = vmul.f32 %v1948_v23, %v1222_v12 }
 0x4ae   : > { %v982_v16 = vpop.f32.mrb[6].mxu0  ;;  %v1376_v17 = vpop.f32.mrb[12].mxu1 }
 0x4af   : > { %v986_v18 = vmul.f32 %v1946_v15, %v982_v16  ;;  %v1829_v19 = vpop.f32.mrb[7].mxu0  ;;  %v1854_v20 = vpop.f32.mrb[13].mxu1  ;;  %v1380_v21 = vsel %vm585_vm2, %v1376_v17, -inf }
 0x4b0   : > { %1381 = vmax.xlane.f32.xlu0 %v1380_v21 }
 0x4b1   : > { %1833 = vmatmul.mubr.msk.f32.vlgmr.msra.gmra.mrb[4].mxu0 %vm585_vm2, %v986_v18 }
 0x4b2   : > { %1846 = vmatpush3.msra.mxu0 %v1227_v22  ;;  %1847 = vmatprep.mubr.msk.f32.mxu0 %vm1978_vm0, %v1979_v11 }
 0x4b3   : > { %1855 = vmatprep.subr.mxu0 %v1979_v11 }
 0x4b9   : > { %1848 = vmatmul.mubr.msk.f32.vlgmr.msra.gmra.mrb[4].mxu0 %vm585_vm2, %v1226_v24 }
 0x4ba   : > { %1857 = vmatprep.mubr.msk.f32.mxu0 %vm1978_vm0, %v1979_v11 }
 0x4c6   : > { %1390 = vrot.lane.b32.xlu0 %v2135_v31, %s1982_s10  ;;  %v1467_v31 = vld [vmem:[%s2248_s5 + $0x18] sm:$0xff] }
 0x53d   : > { %v1382_v25 = vpop.xlane.xlu0 %1381 }
 0x53e   : > { %v1383_v26 = vsub.f32 %v1376_v17, %v1382_v25 }
 0x540   : > { %v1384_v27 = vmul.f32 1.442695, %v1383_v26 }
 0x541   : > { %v1391_v28 = vpop.permute.xlu0 %1390 }
 0x542   : > { %1949 = vpow2.f32 %v1384_v27  ;;  %1856 = vmatpush3.msra.mxu0 %v1391_v28 }
 0x543   : > { %1860 = vmatprep.subr.mxu0 %v1979_v11 }
 0x54c   : > { %v1950_v29 = vpop.eup %1949 }
 0x54d   : > { %1858 = vmatmul.mubr.msk.f32.vlgmr.msra.gmra.mrb[8].mxu0 %vm585_vm2, %v1950_v29  ;;  %v1386_v30 = vsel %vm585_vm2, %v1950_v29, 0.0 }
 0x54e   : > { %1387 = vadd.xlane.f32.xlu0 %v1386_v30  ;;  %1862 = vmatprep.mubr.msk.f32.mxu0 %vm1978_vm0, %v1979_v11 }
 0x54f   : > { %1861 = vmatpush3.msra.mxu0 %v1467_v31 }
 0x5db   : > { %v1388_v35 = vpop.xlane.xlu0 %1387 }
 0x5dc   : > { %1951 = vrcp.f32 %v1388_v35 }
 0x5e6   : > { %v1952_v11 = vpop.eup %1951 }
 0x620   : > { %v1462_v36 = vpop.f32.mrb[8].mxu0 }
 0x621   : > { %v1466_v37 = vmul.f32 %v1952_v11, %v1462_v36  ;;  %v1859_v38 = vpop.f32.mrb[9].mxu0 }
 0x623   : > { %1863 = vmatmul.mubr.msk.f32.vlgmr.msra.gmra.mrb[4].mxu0 %vm585_vm2, %v1466_v37 }
 0x6f6   : > { %v1537_v43 = vpop.f32.mrb[4].mxu0 }
 0x6f7   : > { %v1900_v44 = vadd.f32 %v1537_v43, %v584_v42  ;;  %v1864_v45 = vpop.f32.mrb[5].mxu0 }
 0x6f9   : > { %1874 = vmatmul.mubr.msk.f32.vlgmr.msra.gmra.mrb[14].mxu1 %vm336_vm1, %v1900_v44 }
 0x7cc   : > { %v1615_v46 = vpop.f32.mrb[14].mxu1 }
 0x7cd   : > { %v1616_v47 = vadd.f32 %v1900_v44, %v1615_v46  ;;  %v1875_v48 = vpop.f32.mrb[15].mxu1 }
 0x7cf   : > { %1619 = vst.msk [vmem:[%s320_s14] sm:$0xff] %vm336_vm1, %v1616_v47 }
 0x7d0 PF: > { %s18_s29 = sadd.s32 1, %s1975_s29   ;;  %s2252_s27 = smov %s1971_s28 }
 0x7d1   : > { %p15_p5 = scmp.ge.s32.totalorder %s18_s29, 4   ;;  %s2253_s28 = smov %s2255_s30 }
 0x7d3   :  { %17 = sbr.rel (!%p15_p5) target bundleno = 2 (0x2), region = 85 }

</bundles_post_ra>
